<compile_context>
chip_gen: v7x
topology: tpu7x:2x2x1
jax: 0.10.0
libtpu: 0.0.40
codegen_flags: <defaults>
</compile_context>

<pallas_src>
import functools

import jax
import jax.numpy as jnp
from jax.experimental import pallas as pl
from jax.experimental.pallas import tpu as pltpu


_LANE = 128
_SUBLANE = 8
_TM_CAP = 4096


@functools.lru_cache(maxsize=1)
def _vmem_capacity_bytes():
    try:
        return int(pltpu.get_tpu_info().vmem_capacity_bytes)
    except Exception:
        return 64 << 20     # conservative (v7x-sized) fallback


def _packed_sublane(itemsize):
    # Native packed tile height: 8 rows for 4-byte, 16 for 2-byte, 32 for 1-byte.
    return max(_SUBLANE, 32 // max(1, itemsize))


def _plan_tiles(M, N, itemsize, vmem_cap, split_rows_for_cores):
    """Pick (tm, tn) from a VMEM-aware, dtype-aware budget."""
    sub = _packed_sublane(itemsize)
    # Budget for the raw input tile: account for the double-buffered input plus
    # ~4x f32 working copies (|W|, iota/select temporaries), keep total < 1/2 VMEM.
    denom = 2.0 + 4.0 * (4.0 / itemsize)
    block_budget = int(min(8 << 20, (vmem_cap // 2) / denom))
    block_budget = max(block_budget, 256 << 10)

    # ---- column tiling ------------------------------------------------------
    # Prefer full-width row tiles (single column tile) whenever a packed group
    # of full rows fits the budget: then the column partials need no extra
    # cross-row-tile HBM round trip at all.
    full_width_rows = block_budget // max(1, N * itemsize)
    if N <= _LANE or full_width_rows >= sub:
        tn, num_j = N, 1
        rows_fit = max(sub, min(_TM_CAP, (full_width_rows // sub) * sub))
    else:
        # Column-tiled case: tall (~256-row) tiles so the (num_i, 1, num_j*tn)
        # column-partial output traffic stays < 1% of W's bytes and the
        # per-grid-step overhead is amortized.
        rows_fit = max(sub, (256 // sub) * sub)
        tn = (block_budget // (rows_fit * itemsize)) // _LANE * _LANE
        tn = max(_LANE, tn)
        if tn >= N:
            tn = N
        num_j = -(-N // tn)

    # ---- row tiling ----------------------------------------------------------
    tm = M if M <= rows_fit else min(rows_fit, (M // sub) * sub)

    # On 2-TensorCore parts (v7x) make sure the "parallel" row axis has >= 2
    # iterations so both cores get work on this memory-bound kernel.
    if split_rows_for_cores and M >= 2 * sub and -(-M // tm) < 2:
        half = -(-M // 2)
        tm = -(-half // sub) * sub

    num_i = -(-M // tm)
    return tm, tn, num_i, num_j


def _make_kernel(M, N, tm, tn, num_i, num_j, use_row, use_col,
                 mask_rows, mask_cols):
    def kernel(w_ref, *out_refs):
        refs = list(out_refs)
        row_ref = refs.pop(0) if use_row else None
        col_ref = refs.pop(0) if use_col else None

        i = pl.program_id(0)
        j = pl.program_id(1)

        aw = jnp.abs(w_ref[...].astype(jnp.float32))          # (tm, tn) f32

        def emit(vals):
            if use_row:
                # Rows laid out along lanes -> unmasked, lane-dense (1,1,tm) store.
                row_lane = jnp.sum(vals, axis=1)[None, None, :]
                if num_j == 1:
                    row_ref[...] = row_lane
                else:
                    # Row output block index is constant across j, so the block
                    # is VMEM-resident: accumulate into it directly.
                    @pl.when(j == 0)
                    def _zero():
                        row_ref[...] = jnp.zeros_like(row_ref)

                    row_ref[...] += row_lane
            if use_col:
                col_ref[...] = jnp.sum(vals, axis=0)[None, None, :]   # (1,1,tn)

        if not (mask_rows or mask_cols):
            emit(aw)
            return

        # Only the last tile along a ragged axis contains undefined padding.
        preds = []
        if mask_rows:
            preds.append(i == num_i - 1)
        if mask_cols:
            preds.append(j == num_j - 1)
        tail = preds[0]
        for p in preds[1:]:
            tail = jnp.logical_or(tail, p)

        @pl.when(tail)
        def _masked():
            keep = None
            if mask_rows:
                rid = i * tm + jax.lax.broadcasted_iota(jnp.int32, (tm, tn), 0)
                keep = rid < M
            if mask_cols:
                cid = j * tn + jax.lax.broadcasted_iota(jnp.int32, (tm, tn), 1)
                cm = cid < N
                keep = cm if keep is None else jnp.logical_and(keep, cm)
            emit(jnp.where(keep, aw, 0.0))

        @pl.when(jnp.logical_not(tail))
        def _interior():
            emit(aw)

    return kernel


@functools.partial(
    jax.jit,
    static_argnames=("k", "row_weight", "col_weight", "tile_override"))
def knonzero_rowcol_penalty(W, *, k, row_weight=1.0, col_weight=1.0,
                            tile_override=None):
    """Pallas implementation of KNonzeroRowColPenalty.forward(W) (float32 out).

    `tile_override=(tm, tn)` is a static testing / tuning knob; it is sanitized
    to respect the (8, 128) / full-dim BlockSpec rule.
    """
    M, N = W.shape
    # Static branch selection, identical to the PyTorch module.
    use_row = M <= N
    use_col = M >= N

    itemsize = jnp.dtype(W.dtype).itemsize
    vmem_cap = _vmem_capacity_bytes()
    two_core = vmem_cap <= (64 << 20)        # v7x-sized VMEM -> 2 TensorCores

    if tile_override is not None:
        tm, tn = int(tile_override[0]), int(tile_override[1])
        tm, tn = min(tm, M), min(tn, N)
        if tm != M and tm % _SUBLANE:
            tm = max(_SUBLANE, (tm // _SUBLANE) * _SUBLANE)
        if tn != N and tn % _LANE:
            tn = N if N <= _LANE else max(_LANE, (tn // _LANE) * _LANE)
        num_i, num_j = -(-M // tm), -(-N // tn)
    else:
        tm, tn, num_i, num_j = _plan_tiles(M, N, itemsize, vmem_cap, two_core)

    mask_rows = (num_i * tm != M)
    mask_cols = (num_j * tn != N)

    # ----- lane-dense partial-sum outputs (finalized in the wrapper) ----------
    out_shapes, out_specs = [], []
    if use_row:
        out_shapes.append(jax.ShapeDtypeStruct((num_i, 1, tm), jnp.float32))
        out_specs.append(pl.BlockSpec((1, 1, tm), lambda i, j: (i, 0, 0)))
    if use_col:
        out_shapes.append(
            jax.ShapeDtypeStruct((num_i, 1, num_j * tn), jnp.float32))
        out_specs.append(pl.BlockSpec((1, 1, tn), lambda i, j: (i, 0, j)))

    # ----- explicit scoped-VMEM budget matching the tile plan -----------------
    work = tm * tn * 4
    pad128 = lambda x: -(-max(x, 1) // _LANE) * _LANE
    need = (2 * tm * tn * itemsize                  # double-buffered input tile
            + 4 * work                              # f32 |W| + mask temporaries
            + (2 * _SUBLANE * pad128(tm) * 4 if use_row else 0)
            + (2 * _SUBLANE * pad128(tn) * 4 if use_col else 0)
            + (2 << 20))                            # compiler-internal slack
    vmem_limit = int(min(max(vmem_cap - (2 << 20), 16 << 20),
                         max(32 << 20, need + (8 << 20))))

    kernel = _make_kernel(M, N, tm, tn, num_i, num_j, use_row, use_col,
                          mask_rows, mask_cols)

    results = pl.pallas_call(
        kernel,
        out_shape=tuple(out_shapes),
        grid_spec=pltpu.PrefetchScalarGridSpec(
            num_scalar_prefetch=0,
            grid=(num_i, num_j),
            in_specs=[pl.BlockSpec((tm, tn), lambda i, j: (i, j))],
            out_specs=tuple(out_specs),
        ),
        compiler_params=pltpu.CompilerParams(
            # No cross-row-tile accumulation -> row axis is fully parallel
            # (sharded across TensorCores on v7x); the column axis carries the
            # per-row L1 accumulation and stays "arbitrary".
            dimension_semantics=("parallel", "arbitrary"),
            vmem_limit_bytes=vmem_limit,
        ),
        cost_estimate=pl.CostEstimate(
            flops=3 * M * N,
            transcendentals=0,
            bytes_accessed=M * N * itemsize
            + 4 * (num_i * tm + num_i * num_j * tn),
        ),
    )(W)
    if not isinstance(results, (tuple, list)):
        results = (results,)

    # ----- tiny finalize in plain JAX (fused into this jit) --------------------
    kf = jnp.float32(k)
    loss = jnp.float32(0.0)
    idx = 0
    if use_row:
        row_l1 = results[idx].reshape(num_i * tm)[:M]
        idx += 1
        loss = loss + jnp.float32(row_weight) * jnp.mean((row_l1 - kf) ** 2)
    if use_col:
        col_l1 = results[idx][:, 0, :].sum(axis=0)[:N]
        idx += 1
        loss = loss + jnp.float32(col_weight) * jnp.mean((col_l1 - kf) ** 2)
    return loss


def _reference(W, k, row_weight=1.0, col_weight=1.0):
    """Pure-JAX reference mirroring the PyTorch forward (in float32)."""
    M, N = W.shape
    Wf = W.astype(jnp.float32)
    row_l1 = jnp.abs(Wf).sum(axis=1)
    col_l1 = jnp.abs(Wf).sum(axis=0)
    row_pen = jnp.float32(0.0)
    col_pen = jnp.float32(0.0)
    if M == N:
        row_pen = jnp.mean((row_l1 - k) ** 2)
        col_pen = jnp.mean((col_l1 - k) ** 2)
    elif M > N:
        col_pen = jnp.mean((col_l1 - k) ** 2)
    else:
        row_pen = jnp.mean((row_l1 - k) ** 2)
    return jnp.float32(row_weight) * row_pen + jnp.float32(col_weight) * col_pen


if __name__ == "__main__":
    key = jax.random.PRNGKey(0)
    k_val, rw, cw = 3.0, 1.0, 0.5

    # (name, (M, N), forced tiles or None).  Forced-tile cases exercise the
    # multi-tile grids, ragged tail-tile masking, the column-tiled row
    # accumulation path and the tail-only masking specialization.
    cases = [
        ("wide   M<N, row penalty, auto tiles", (16, 32), None),
        ("square M==N, both penalties, auto tiles", (16, 16), None),
        ("tall   M>N, col penalty, auto tiles", (32, 16), None),
        ("square both penalties, forced ragged tiles", (264, 264), (48, 128)),
        ("wide   row penalty, forced column tiling", (20, 300), (8, 128)),
    ]

    ok = True
    for name, (M, N), tiles in cases:
        key, subkey = jax.random.split(key)
        W = jax.random.normal(subkey, (M, N), dtype=jnp.float32)

        got = knonzero_rowcol_penalty(W, k=k_val, row_weight=rw, col_weight=cw,
                                      tile_override=tiles)
        got = jax.block_until_ready(got)
        want = _reference(W, k_val, rw, cw)

        if not jnp.allclose(got, want, rtol=2e-5, atol=1e-5):
            ok = False
            print(f"MISMATCH [{name}]: pallas={got} ref={want}")

    if ok:
        print("KERNEL_OK")
</pallas_src>

<mosaic_0001>
module attributes {stable_mosaic.version = 11 : i64} {
  func.func @kernel(%arg0: i32, %arg1: i32, %arg2: memref<8x32xf32, #tpu.memory_space<vmem>>, %arg3: memref<1x1x8xf32, #tpu.memory_space<vmem>>) attributes {dimension_semantics = [#tpu.dimension_semantics<parallel>, #tpu.dimension_semantics<arbitrary>], iteration_bounds = array<i64: 2, 1>, scalar_prefetch = 0 : i64, scratch_operands = 0 : i64, tpu.core_type = #tpu.core_type<tc>, window_params = [{transform_indices = @transform_0, window_bounds = array<i64: 8, 32>}, {transform_indices = @transform_1, window_bounds = array<i64: 1, 1, 8>}]} {
    %c0 = arith.constant 0 : index
    %c0_0 = arith.constant 0 : index
    %0 = vector.load %arg2[%c0, %c0_0] : memref<8x32xf32, #tpu.memory_space<vmem>>, vector<8x32xf32>
    %1 = math.absf %0 : vector<8x32xf32>
    %cst = arith.constant dense<0.000000e+00> : vector<8xf32>
    %2 = vector.multi_reduction <add>, %1, %cst [1] : vector<8x32xf32> to vector<8xf32>
    %3 = vector.shape_cast %2 : vector<8xf32> to vector<1x1x8xf32>
    %c0_1 = arith.constant 0 : index
    %c0_2 = arith.constant 0 : index
    %c0_3 = arith.constant 0 : index
    %4 = vector.load %arg3[%c0_1, %c0_2, %c0_3] : memref<1x1x8xf32, #tpu.memory_space<vmem>>, vector<1x1x8xf32>
    tpu.vector_store %arg3[%c0_1, %c0_2, %c0_3], %3 {strides = array<i32>} : memref<1x1x8xf32, #tpu.memory_space<vmem>>, vector<1x1x8xf32>,
    return
  }
  func.func @transform_0(%arg0: i32, %arg1: i32) -> (i32, i32) {
    %c0_i32 = arith.constant 0 : i32
    return %arg0, %arg1 : i32, i32
  }
  func.func @transform_1(%arg0: i32, %arg1: i32) -> (i32, i32, i32) {
    %c0_i32 = arith.constant 0 : i32
    %c0_i32_0 = arith.constant 0 : i32
    %c0_i32_1 = arith.constant 0 : i32
    return %arg0, %c0_i32, %c0_i32_0 : i32, i32, i32
  }
}

</mosaic_0001>

<bundles_post_ra>
// kernel: knonzero_rowcol_penalty.1
= control target key start
LH: loop header
LB: loop body
LE: loop exit
PB: predicated region body
PF: predicated region fallthrough
CT: control target
= control target key end

     0   :  { %6 = vsyncpa [#allocation3], 0  ;;  %s509_s0 = inlined_call_operand.hbm [shape: f32[16,32], index: 0, kind: input, shape index: {}]   ;;  %s510_s1 = inlined_call_operand.vmem [shape: f32[2,1,8], index: 1, kind: output, shape index: {}]  }
   0x1   :  { %8 = vsyncpa [#allocation3 + $0x1], 0  ;;  %s384_s6 = smov 0   ;;  %s386_s7 = smov 0  }
   0x2   :  { %s388_s8 = smov 0   ;;  %s390_s9 = smov 0  }
   0x3   :  { %s392_s10 = smov 0   ;;  %s394_s11 = smov 0  }
   0x4 LB: > { %s226_s12 = sadd.s32 4294967295, %s371_s11   ;;  %s26_s13 = sadd.s32 1, %s367_s10  ;;  %s371_s11 = sphi %s394_s11, %s14_s11   ;;  %s367_s10 = sphi %s392_s10, %s520_s10   ;;  %s363_s9 = sphi %s390_s9, %s519_s9   ;;  %s359_s8 = sphi %s388_s8, %s518_s8   ;;  %s355_s7 = sphi %s386_s7, %s517_s7   ;;  %s351_s6 = sphi %s384_s6, %s516_s6  }
   0x5   : > { %p28_p0 = scmp.ge.s32.totalorder %s26_s13, 2  ;;  %s35_s14 = sadd.s32 1, %s359_s8 }
   0x6   : > { %p42_p1 = scmp.ne.s32.totalorder %s359_s8, %s355_s7  ;;  %p43_p2 = scmp.eq.s32.totalorder %s371_s11, 0 }
   0x7   : > { %s522_s13 = smov (%p28_p0, %s26_s13), 0  ;;  %p48_p4 = scmp.ne.s32.totalorder %s355_s7, %s351_s6 }
   0x8   : > { %p420_p3 = por %p43_p2, %p42_p1  ;;  %s30_s16 = ssub.s32 %s367_s10, %s522_s13 }
   0x9   : > { %p49_p5 = scmp.eq.s32.totalorder %s226_s12, 0  ;;  %p33_p6 = scmp.eq.s32.totalorder %s30_s16, 0 }
   0xa   : > { %p242_p8 = scmp.lt.s32.totalorder %s371_s11, 2  ;;  %s98_s19 = sand.u32 1, %s359_s8  }
   0xb   : > { %p427_p7 = por %p49_p5, %p48_p4  ;;  %s231_s20 = sshll.u32 %s367_s10, 7 }
   0xc   : > { %s433_s18 = scalar_select %p33_p6, %s359_s8, %s35_s14  }
   0xd   : > { %s230_s21 = sshll.u32 %s98_s19, 3  ;;  %s440_s24 = scalar_lea.hbm %s509_s0, %s231_s20 }
   0xe   : > { %s102_s25 = scalar_lea.vmem [#allocation2], %s230_s21  ;;  %p444_p9 = pnand %p242_p8, %p420_p3 }
   0xf   : > { %s110_s26 = sshll.u32 %s102_s25, 4  ;;  %s99_s28 = scalar_lea.sflag [#allocation3], %s98_s19  ;;  %s448_s26 = int_to_ptr.vmem [resolvable:$true] %s110_s26 }
  0x10   : > { %s291_s29 = scalar_lea.hbm %s440_s24, 128  ;;  %p293_p13 = pneg %p444_p9 }
  0x11   : > { %p292_p12 = scmp.ne.s32.totalorder %s440_s24, %s291_s29  ;;  %s296_s3 = scalar_lea.hbm %s509_s0, 256 }
  0x12   : > { %p297_p2 = scmp.lt.u32.totalorder %s440_s24, %s509_s0  ;;  %p298_p3 = scmp.lt.u32.totalorder %s296_s3, %s291_s29 }
  0x13   : > { %p294_p0 = pnand %p293_p13, %p292_p12  ;;  %p300_p5 = scmp.lt.u32.totalorder %s291_s29, %s440_s24 }
  0x14   : > { %p299_p4 = por %p298_p3, %p297_p2 }
  0x15   : > { %p295_p1 = pneg %p294_p0 }
  0x16   : > { %p301_p6 = por %p300_p5, %p299_p4 }
  0x18   : > { %p302_p8 = pnand %p301_p6, %p295_p1 }
  0x1a   : > { %305 = shalt.err (!%p302_p8)
}
  0x1b   : > { %s306_s6 = scalar_lea.vmem %s448_s26, 128  ;;  %s373_s12 = smov [#allocation2]  }
  0x1c   : > { %p307_p12 = scmp.ne.s32.totalorder %s448_s26, %s306_s6  ;;  %s311_s14 = sshll.u32 %s373_s12, 4  ;;  %s312_s14 = int_to_ptr.vmem [resolvable:$false] %s311_s14 }
  0x1d   : > { %s313_s15 = scalar_lea.vmem %s312_s14, 256  ;;  %p314_p11 = scmp.lt.s32.totalorder %s448_s26, %s312_s14 }
  0x1e   : > { %p309_p0 = pnand %p307_p12, %p293_p13  ;;  %p315_p2 = scmp.lt.s32.totalorder %s313_s15, %s306_s6 }
  0x20   : > { %p310_p10 = pneg %p309_p0  ;;  %p316_p3 = por %p315_p2, %p314_p11 }
  0x22   : > { %p317_p4 = pnand %p316_p3, %p310_p10 }
  0x24   : > { %320 = shalt.err (!%p317_p4)
}
  0x25   : > { %241 = dma.hbm_to_vmem [thread:$0]  (!%p444_p9), %s440_s24, 128, %s448_s26, %s99_s28  }
  0x26   : > { %p514_p1 = scmp.lt.s32.totalorder %s371_s11, 3  ;;  %p515_p5 = scmp.ge.s32.totalorder %s371_s11, 1 }
  0x28   : > { %p116_p13 = pnand %p515_p5, %p514_p1 }
  0x29   : > { %s121_s16 = sand.u32 (!%p116_p13), 1, %s355_s7  }
  0x2a   : > { %119 = sbr.rel (%p116_p13) target bundleno = 199 (0xc7), region = 24  ;;  %s233_s19 = sshll.u32 (!%p116_p13), %s121_s16, 3 }
  0x2b   : > { %s122_s20 = scalar_lea.sflag (!%p116_p13), [#allocation3], %s121_s16  ;;  %s125_s21 = scalar_lea.vmem (!%p116_p13), [#allocation2], %s233_s19 }
  0x31   : > { %346 = dma.done.wait (%p427_p7), %s122_s20, 128  }
  0x32   : > { %348 = vsyncadd (%p427_p7), %s122_s20, 4294967168  ;;  %v145_v0 = vld [vmem:[%s125_s21] sm:$0xff]  ;;  %vm147_vm0 = vcmask 261120   ;;  %v152_v3 = vlaneseq  ;;  %p142_p9 = scmp.lt.s32.totalorder %s363_s9, 1  ;;  %vm159_vm1 = vcmask 57344  }
  0x33   : > { %v146_v1 = vand.u32 2147483647, %v145_v0 }
  0x34   : > { %v153_v4 = vand.u32 127, %v152_v3  ;;  %v155_v5 = vshrl.u32 %v152_v3, 7  ;;  %s524_s9 = smov (!%p142_p9, %s363_s9), 1 }
  0x35   : > { %v148_v2 = vsel %vm147_vm0, %v146_v1, 0.0  ;;  %s144_s24 = scalar_lea.vmem %s510_s1, %s524_s9 }
  0x36   : > { %149 = vadd.xlane.f32.xlu0 %v148_v2  ;;  %v156_v6 = vsub.s32 %v153_v4, %v155_v5 }
  0xc3   : > { %v150_v7 = vpop.xlane.xlu0 %149 }
  0xc4   : > { %v157_v8 = vrot.slane %v150_v7, %v156_v6 }
  0xc6   : > { %160 = vst.msk [vmem:[%s144_s24] sm:$0x1] %vm159_vm1, %v157_v8 }
  0xc7 PF: > { %s14_s11 = sadd.s32 1, %s371_s11   ;;  %s516_s6 = smov %s355_s7 }
  0xc8   : > { %p11_p7 = scmp.ge.s32.totalorder %s14_s11, 4   ;;  %s517_s7 = smov %s359_s8 }
  0xc9   : > { %s518_s8 = smov %s433_s18  ;;  %s519_s9 = smov %s367_s10 }
  0xca   : > { %s520_s10 = smov %s522_s13  ;;  %13 = sbr.rel (!%p11_p7) target bundleno = 4 (0x4), region = 64 }
  0xd1   :  { %178 = vsyncpa [#allocation3], 1 }
  0xd2   :  { %180 = vsyncpa [#allocation3 + $0x1], 1 }

</bundles_post_ra>
